<compile_context>
chip_gen: v7x
topology: tpu7x:2x2x1
jax: 0.10.0
libtpu: 0.0.40
codegen_flags: <defaults>
</compile_context>

<pallas_src>
import numpy as np
import jax
import jax.numpy as jnp
from jax.experimental import pallas as pl
from jax.experimental.pallas import tpu as pltpu


# ---------------------------------------------------------------------------
# Mimetic operator construction (MOLE-style 2nd-order 2D gradient), host side.
# ---------------------------------------------------------------------------
def _grad1d(k, m, dx):
    assert k == 2, "only 2nd-order mimetic gradient implemented"
    G = np.zeros((m + 1, m + 2), dtype=np.float64)
    G[0, 0:3] = [-8.0 / 3.0, 3.0, -1.0 / 3.0]
    G[-1, -3:] = [1.0 / 3.0, -3.0, 8.0 / 3.0]
    for i in range(1, m):
        G[i, i] = -1.0
        G[i, i + 1] = 1.0
    return G / dx


def GRAD2D(k, m, dx, n, dy):
    Gx = _grad1d(k, m, dx)                      # (m+1, m+2)
    Gy = _grad1d(k, n, dy)                      # (n+1, n+2)
    Im = np.zeros((m + 2, m)); Im[1:m + 1, :] = np.eye(m)
    In = np.zeros((n + 2, n)); In[1:n + 1, :] = np.eye(n)
    Sx = np.kron(In.T, Gx)                      # (n*(m+1), (n+2)*(m+2))
    Sy = np.kron(Gy, Im.T)                      # ((n+1)*m, (n+2)*(m+2))
    return np.vstack([Sx, Sy])                  # (1404, 784) float64

# TODO(synk): DIV2D is constructed in the PyTorch __init__ but unused in
# forward(), so it is intentionally not ported.


# ---------------------------------------------------------------------------
# Pallas kernel
# ---------------------------------------------------------------------------
def _swish(x):
    return x * jax.nn.sigmoid(x)


def _make_kernel(bf16_elementwise):
    """Kernel factory; `bf16_elementwise` gates the input-swish precision."""

    def mimetic_kernel(x_ref, w1_ref, b1_ref, w23_ref, b23_ref,
                       wo_ref, bo_ref, out_ref):
        # x tile: (TB, 784) bf16 (the dominant HBM stream).
        x = x_ref[...]
        if not bf16_elementwise:
            # v5e and older: no bf16 VPU/EUP -> do the wide swish in f32.
            x = x.astype(jnp.float32)
        h = _swish(x)
        # fc1 + swish: (TB, 784) @ (784, 28) -> (TB, 28); bf16 MXU, f32 acc.
        h = jnp.dot(h.astype(jnp.bfloat16), w1_ref[...],
                    preferred_element_type=jnp.float32) + b1_ref[...]
        h = _swish(h)
        # fc2 -> mimetic gradient -> fc3 fully folded on the host into a
        # single (28, d_out) matrix (kept in f32 -- it is tiny):
        # (TB, 28) @ (28, d_out) -> (TB, d_out)
        h = jnp.dot(h, w23_ref[...], preferred_element_type=jnp.float32)
        h = _swish(h + b23_ref[...])
        # fcOut as a VPU/XLU lane reduce (an N=1, K=16 matmul would waste MXU).
        out_ref[...] = (jnp.sum(h * wo_ref[...], axis=-1, keepdims=True)
                        + bo_ref[...])

    return mimetic_kernel


def _round_up(x, m):
    return (x + m - 1) // m * m


def _bf16_elementwise_ok():
    """bf16 VPU/EUP exists on v6e/v7x; keep f32 element-wise math elsewhere."""
    try:
        kind = jax.devices()[0].device_kind.lower()
    except Exception:
        return False
    return ("v6" in kind) or ("v7" in kind) or ("7x" in kind)


def mimetic_forward(x, params, *, tb=1024):
    """x: any shape (B, ...) reshaped to (B, d_in); returns shape (B,)."""
    B = x.shape[0]
    # bf16 input stream: halves HBM traffic of the dominant (memory-bound) read.
    x2 = x.reshape(B, -1).astype(jnp.bfloat16)
    d_in = x2.shape[1]

    # TB: multiple of 16 (bf16 sublane pack), capped so the grid always has at
    # least 2 steps -> dimension_semantics=("parallel",) shards across v7x's
    # two TensorCores even for tiny batches (harmless on v5e/v6e).
    TB = min(tb, max(16, _round_up((B + 1) // 2, 16)))
    n_tiles = max(2, pl.cdiv(B, TB))
    Bp = n_tiles * TB
    if Bp != B:
        x2 = jnp.pad(x2, ((0, Bp - B), (0, 0)))

    weights = (params["w1"], params["b1"], params["w23"], params["b23"],
               params["wo"], params["bo"])

    def resident(arr):   # weights: DMA'd once, stay VMEM-resident across tiles
        return pl.BlockSpec(arr.shape, lambda i: (0, 0))

    kernel = _make_kernel(_bf16_elementwise_ok())

    out = pl.pallas_call(
        kernel,
        out_shape=jax.ShapeDtypeStruct((Bp, 1), jnp.float32),
        grid=(n_tiles,),
        in_specs=[pl.BlockSpec((TB, d_in), lambda i: (i, 0))]
                 + [resident(w) for w in weights],
        out_specs=pl.BlockSpec((TB, 1), lambda i: (i, 0)),
        compiler_params=pltpu.CompilerParams(
            dimension_semantics=("parallel",)),
    )(x2, *weights)
    # Padded rows hold bias-driven garbage: the [:B] slice is load-bearing.
    return out[:B, 0]   # == out.view(-1)


# ---------------------------------------------------------------------------
# Deterministic parameter construction + reference check
# ---------------------------------------------------------------------------
def make_params(key, d_in, d_out):
    grad = GRAD2D(2, 26, 1, 26, 1)              # (1404, 784) float64
    assert grad.shape == (36 * 39, d_in)

    def linear(k, fan_in, fan_out):
        kw, kb = jax.random.split(k)
        bound = 1.0 / np.sqrt(fan_in)
        w = jax.random.uniform(kw, (fan_in, fan_out), jnp.float32, -bound, bound)
        b = jax.random.uniform(kb, (1, fan_out), jnp.float32, -bound, bound)
        return np.asarray(w, np.float64), np.asarray(b, np.float64)

    k1, k2, k3, k4 = jax.random.split(key, 4)
    w1, b1 = linear(k1, d_in, 28)
    w2, b2 = linear(k2, 28, d_in)
    w3, b3 = linear(k3, 36 * 39, d_out)
    wo, bo = linear(k4, d_out, 1)
    wo_row = wo.T                                # (1, d_out)

    # Full host-side fold (float64): fc2 -> grad -> fc3 are back-to-back
    # linear maps, so
    #   (h @ w2 + b2) @ grad.T @ w3 + b3 == h @ W23 + b23
    W23 = w2 @ grad.T @ w3                       # (28, d_out)
    b23 = b2 @ grad.T @ w3 + b3                  # (1, d_out)

    kernel_params = {
        "w1": jnp.asarray(w1, jnp.bfloat16),     # only the big MXU operand is bf16
        "b1": jnp.asarray(b1, jnp.float32),
        "w23": jnp.asarray(W23, jnp.float32),    # tiny: keep f32 for precision
        "b23": jnp.asarray(b23, jnp.float32),
        "wo": jnp.asarray(wo_row, jnp.float32),
        "bo": jnp.asarray(bo, jnp.float32),
    }
    ref_params = {"w1": w1, "b1": b1, "w2": w2, "b2": b2, "grad": grad,
                  "w3": w3, "b3": b3, "wo": wo, "bo": bo}
    return kernel_params, ref_params


def _swish_np(x):
    return x / (1.0 + np.exp(-x))


def reference_forward(x, p):
    """Unfolded float64 reference matching the PyTorch forward exactly."""
    h = np.asarray(x, np.float64).reshape(x.shape[0], -1)
    h = _swish_np(h)
    h = _swish_np(h @ p["w1"] + p["b1"])
    h = h @ p["w2"] + p["b2"]                    # fc2
    h = (p["grad"] @ h.T).T                      # mimetic gradient, as in PyTorch
    h = _swish_np(h @ p["w3"] + p["b3"])
    h = h @ p["wo"] + p["bo"]                    # fcOut
    return h.reshape(-1)


if __name__ == "__main__":
    D_IN = 28 * 28        # forced by GRAD2D(2, 26, 1, 26, 1) -> (36*39, 784)
    D_OUT = 16
    B = 2

    key = jax.random.PRNGKey(0)
    k_params, k_x = jax.random.split(key)
    kparams, ref_params = make_params(k_params, D_IN, D_OUT)

    # Input analogous to a (B, 1, 28, 28) NCHW image; forward flattens it.
    x = jax.random.normal(k_x, (B, 1, 28, 28), dtype=jnp.float32)

    fwd = jax.jit(lambda xx: mimetic_forward(xx, kparams))
    out = jax.block_until_ready(fwd(x))
    assert out.shape == (B,), out.shape

    ref = reference_forward(np.asarray(x), ref_params)
    if not np.allclose(np.asarray(out, np.float64), ref, rtol=2e-2, atol=2e-2):
        raise AssertionError(f"mismatch: kernel={out}, ref={ref}")

    print("KERNEL_OK")
</pallas_src>

<mosaic_0001>
module attributes {stable_mosaic.version = 11 : i64} {
  func.func @mimetic_kernel(%arg0: i32, %arg1: memref<16x784xbf16, #tpu.memory_space<vmem>>, %arg2: memref<784x28xbf16, #tpu.memory_space<vmem>>, %arg3: memref<1x28xf32, #tpu.memory_space<vmem>>, %arg4: memref<28x16xf32, #tpu.memory_space<vmem>>, %arg5: memref<1x16xf32, #tpu.memory_space<vmem>>, %arg6: memref<1x16xf32, #tpu.memory_space<vmem>>, %arg7: memref<1x1xf32, #tpu.memory_space<vmem>>, %arg8: memref<16x1xf32, #tpu.memory_space<vmem>>) attributes {dimension_semantics = [#tpu.dimension_semantics<parallel>], iteration_bounds = array<i64: 2>, scalar_prefetch = 0 : i64, scratch_operands = 0 : i64, tpu.core_type = #tpu.core_type<tc>, window_params = [{transform_indices = @transform_0, window_bounds = array<i64: 16, 784>}, {pipeline_mode = #tpu.pipeline_mode<synchronous>, transform_indices = @transform_1, window_bounds = array<i64: 784, 28>}, {pipeline_mode = #tpu.pipeline_mode<synchronous>, transform_indices = @transform_2, window_bounds = array<i64: 1, 28>}, {pipeline_mode = #tpu.pipeline_mode<synchronous>, transform_indices = @transform_3, window_bounds = array<i64: 28, 16>}, {pipeline_mode = #tpu.pipeline_mode<synchronous>, transform_indices = @transform_4, window_bounds = array<i64: 1, 16>}, {pipeline_mode = #tpu.pipeline_mode<synchronous>, transform_indices = @transform_5, window_bounds = array<i64: 1, 16>}, {pipeline_mode = #tpu.pipeline_mode<synchronous>, transform_indices = @transform_6, window_bounds = array<i64: 1, 1>}, {transform_indices = @transform_7, window_bounds = array<i64: 16, 1>}]} {
    %c0 = arith.constant 0 : index
    %c0_0 = arith.constant 0 : index
    %0 = vector.load %arg1[%c0, %c0_0] : memref<16x784xbf16, #tpu.memory_space<vmem>>, vector<16x784xbf16>
    %1 = arith.extf %0 : vector<16x784xbf16> to vector<16x784xf32>
    %2 = arith.negf %1 : vector<16x784xf32>
    %3 = math.exp %2 : vector<16x784xf32>
    %cst = arith.constant 1.000000e+00 : f32
    %4 = vector.broadcast %cst : f32 to vector<16x784xf32>
    %5 = arith.addf %4, %3 : vector<16x784xf32>
    %6 = arith.divf %4, %5 : vector<16x784xf32>
    %7 = arith.mulf %1, %6 : vector<16x784xf32>
    %8 = arith.truncf %7 : vector<16x784xf32> to vector<16x784xbf16>
    %c0_1 = arith.constant 0 : index
    %c0_2 = arith.constant 0 : index
    %9 = vector.load %arg2[%c0_1, %c0_2] : memref<784x28xbf16, #tpu.memory_space<vmem>>, vector<784x28xbf16>
    %cst_3 = arith.constant dense<0.000000e+00> : vector<16x28xf32>
    %10 = tpu.matmul %8, %9, %cst_3 {dimension_numbers = #tpu.dot_dimension_numbers<[1], [0], [0], [1], [0, 0, 1, 1], [], []>} : vector<16x784xbf16>, vector<784x28xbf16>, vector<16x28xf32> -> vector<16x28xf32>
    %c0_4 = arith.constant 0 : index
    %c0_5 = arith.constant 0 : index
    %11 = vector.load %arg3[%c0_4, %c0_5] : memref<1x28xf32, #tpu.memory_space<vmem>>, vector<1x28xf32>
    %12 = vector.broadcast %11 : vector<1x28xf32> to vector<16x28xf32>
    %13 = arith.addf %10, %12 : vector<16x28xf32>
    %14 = arith.negf %13 : vector<16x28xf32>
    %15 = math.exp %14 : vector<16x28xf32>
    %cst_6 = arith.constant 1.000000e+00 : f32
    %16 = vector.broadcast %cst_6 : f32 to vector<16x28xf32>
    %17 = arith.addf %16, %15 : vector<16x28xf32>
    %18 = arith.divf %16, %17 : vector<16x28xf32>
    %19 = arith.mulf %13, %18 : vector<16x28xf32>
    %c0_7 = arith.constant 0 : index
    %c0_8 = arith.constant 0 : index
    %20 = vector.load %arg4[%c0_7, %c0_8] : memref<28x16xf32, #tpu.memory_space<vmem>>, vector<28x16xf32>
    %cst_9 = arith.constant dense<0.000000e+00> : vector<16x16xf32>
    %21 = tpu.matmul %19, %20, %cst_9 {dimension_numbers = #tpu.dot_dimension_numbers<[1], [0], [0], [1], [0, 0, 1, 1], [], []>} : vector<16x28xf32>, vector<28x16xf32>, vector<16x16xf32> -> vector<16x16xf32>
    %c0_10 = arith.constant 0 : index
    %c0_11 = arith.constant 0 : index
    %22 = vector.load %arg5[%c0_10, %c0_11] : memref<1x16xf32, #tpu.memory_space<vmem>>, vector<1x16xf32>
    %23 = vector.broadcast %22 : vector<1x16xf32> to vector<16x16xf32>
    %24 = arith.addf %21, %23 : vector<16x16xf32>
    %25 = arith.negf %24 : vector<16x16xf32>
    %26 = math.exp %25 : vector<16x16xf32>
    %cst_12 = arith.constant 1.000000e+00 : f32
    %27 = vector.broadcast %cst_12 : f32 to vector<16x16xf32>
    %28 = arith.addf %27, %26 : vector<16x16xf32>
    %29 = arith.divf %27, %28 : vector<16x16xf32>
    %30 = arith.mulf %24, %29 : vector<16x16xf32>
    %c0_13 = arith.constant 0 : index
    %c0_14 = arith.constant 0 : index
    %31 = vector.load %arg6[%c0_13, %c0_14] : memref<1x16xf32, #tpu.memory_space<vmem>>, vector<1x16xf32>
    %32 = vector.broadcast %31 : vector<1x16xf32> to vector<16x16xf32>
    %33 = arith.mulf %30, %32 : vector<16x16xf32>
    %cst_15 = arith.constant dense<0.000000e+00> : vector<16xf32>
    %34 = vector.multi_reduction <add>, %33, %cst_15 [1] : vector<16x16xf32> to vector<16xf32>
    %35 = vector.shape_cast %34 : vector<16xf32> to vector<16x1xf32>
    %c0_16 = arith.constant 0 : index
    %c0_17 = arith.constant 0 : index
    %36 = vector.load %arg7[%c0_16, %c0_17] : memref<1x1xf32, #tpu.memory_space<vmem>>, vector<1x1xf32>
    %37 = vector.broadcast %36 : vector<1x1xf32> to vector<16x1xf32>
    %38 = arith.addf %35, %37 : vector<16x1xf32>
    %c0_18 = arith.constant 0 : index
    %c0_19 = arith.constant 0 : index
    %39 = vector.load %arg8[%c0_18, %c0_19] : memref<16x1xf32, #tpu.memory_space<vmem>>, vector<16x1xf32>
    tpu.vector_store %arg8[%c0_18, %c0_19], %38 {strides = array<i32>} : memref<16x1xf32, #tpu.memory_space<vmem>>, vector<16x1xf32>,
    return
  }
  func.func @transform_0(%arg0: i32) -> (i32, i32) {
    %c0_i32 = arith.constant 0 : i32
    %c0_i32_0 = arith.constant 0 : i32
    return %arg0, %c0_i32 : i32, i32
  }
  func.func @transform_1(%arg0: i32) -> (i32, i32) {
    %c0_i32 = arith.constant 0 : i32
    %c0_i32_0 = arith.constant 0 : i32
    %c0_i32_1 = arith.constant 0 : i32
    return %c0_i32, %c0_i32_0 : i32, i32
  }
  func.func @transform_2(%arg0: i32) -> (i32, i32) {
    %c0_i32 = arith.constant 0 : i32
    %c0_i32_0 = arith.constant 0 : i32
    %c0_i32_1 = arith.constant 0 : i32
    return %c0_i32, %c0_i32_0 : i32, i32
  }
  func.func @transform_3(%arg0: i32) -> (i32, i32) {
    %c0_i32 = arith.constant 0 : i32
    %c0_i32_0 = arith.constant 0 : i32
    %c0_i32_1 = arith.constant 0 : i32
    return %c0_i32, %c0_i32_0 : i32, i32
  }
  func.func @transform_4(%arg0: i32) -> (i32, i32) {
    %c0_i32 = arith.constant 0 : i32
    %c0_i32_0 = arith.constant 0 : i32
    %c0_i32_1 = arith.constant 0 : i32
    return %c0_i32, %c0_i32_0 : i32, i32
  }
  func.func @transform_5(%arg0: i32) -> (i32, i32) {
    %c0_i32 = arith.constant 0 : i32
    %c0_i32_0 = arith.constant 0 : i32
    %c0_i32_1 = arith.constant 0 : i32
    return %c0_i32, %c0_i32_0 : i32, i32
  }
  func.func @transform_6(%arg0: i32) -> (i32, i32) {
    %c0_i32 = arith.constant 0 : i32
    %c0_i32_0 = arith.constant 0 : i32
    %c0_i32_1 = arith.constant 0 : i32
    return %c0_i32, %c0_i32_0 : i32, i32
  }
  func.func @transform_7(%arg0: i32) -> (i32, i32) {
    %c0_i32 = arith.constant 0 : i32
    %c0_i32_0 = arith.constant 0 : i32
    return %arg0, %c0_i32 : i32, i32
  }
}

</mosaic_0001>

<bundles_post_ra>
// kernel: _lambda_.1
= control target key start
LH: loop header
LB: loop body
LE: loop exit
PB: predicated region body
PF: predicated region fallthrough
CT: control target
= control target key end

     0   :  { %s1823_s0 = inlined_call_operand.vmem [shape: bf16[32,784], index: 0, kind: input, shape index: {}]   ;;  %s1824_s1 = inlined_call_operand.hbm [shape: bf16[784,28], index: 1, kind: input, shape index: {}]   ;;  %s1825_s2 = inlined_call_operand.vmem [shape: f32[1,28], index: 2, kind: input, shape index: {}]   ;;  %s1826_s3 = inlined_call_operand.vmem [shape: f32[28,16], index: 3, kind: input, shape index: {}]   ;;  %s1827_s4 = inlined_call_operand.vmem [shape: f32[1,16], index: 4, kind: input, shape index: {}]   ;;  %s1828_s5 = inlined_call_operand.vmem [shape: f32[1,16], index: 5, kind: input, shape index: {}]   ;;  %s1829_s6 = inlined_call_operand.<no memory space> [shape: f32[1,1], index: 6, kind: input, shape index: {}]   ;;  %s1830_s7 = inlined_call_operand.vmem [shape: f32[32,1], index: 7, kind: output, shape index: {}]  }
   0x1   :  { %v12_v0 = vstv %s1829_s6 }
   0x2   :  { %13 = vst [vmem:[#allocation2] sm:$0x1] %v12_v0 }
   0x3   :  { %14 = vsyncpa [#allocation4], 0  ;;  %s1641_s26 = smov 0  }
   0x4 LB: > { %s1217_s27 = sadd.s32 4294967295, %s1590_s26   ;;  %p1219_p0 = scmp.ge.s32.totalorder %s1590_s26, 1  ;;  %s1590_s26 = sphi %s1641_s26, %s20_s26  }
   0x5   : > { %p203_p1 = scmp.lt.s32.totalorder %s1590_s26, 3  ;;  %s1592_s28 = smov [#allocation3]  }
   0x6   : > { %s215_s29 = sshll.u32 %s1592_s28, 4  ;;  %p1655_p3 = scmp.eq.s32.totalorder %s1217_s27, 0  ;;  %s216_s29 = int_to_ptr.vmem [resolvable:$true] %s215_s29 }
   0x7   : > { %p1649_p2 = pnand %p1219_p0, %p203_p1  ;;  %s1552_s11 = scalar_lea.hbm %s1824_s1, 6272 }
   0x8   : > { %s1835_s30 = scalar_select %p1655_p3, 1, 0 }
   0x9   : > { %s1834_s6 = scalar_select %p1649_p2, 1, 0 }
   0xa   : > { %p1411_p4 = pneg %p1649_p2  ;;  %p1553_p6 = scmp.ne.s32.totalorder %s1824_s1, %s1552_s11 }
   0xb   : > { %p1559_p10 = scmp.lt.u32.totalorder %s1552_s11, %s1824_s1 }
   0xc   : > { %p1663_p5 = pnand %p1655_p3, %p1411_p4 }
   0xe   : > { %p1554_p7 = pneg %p1663_p5 }
  0x10   : > { %p1555_p8 = pnand %p1554_p7, %p1553_p6 }
  0x12   : > { %p1556_p9 = pneg %p1555_p8 }
  0x14   : > { %p1561_p11 = pnand %p1559_p10, %p1556_p9 }
  0x16   : > { %1564 = shalt.err (!%p1561_p11)
}
  0x17   : > { %s1565_s16 = scalar_lea.vmem %s216_s29, 6272  ;;  %p1573_p1 = scmp.lt.s32.totalorder %s216_s29, %s216_s29 }
  0x18   : > { %p1566_p12 = scmp.ne.s32.totalorder %s216_s29, %s1565_s16  ;;  %p1574_p4 = scmp.lt.s32.totalorder %s1565_s16, %s1565_s16 }
  0x1a   : > { %p1568_p13 = pnand %p1566_p12, %p1554_p7  ;;  %p1575_p3 = por %p1574_p4, %p1573_p1 }
  0x1c   : > { %p1569_p0 = pneg %p1568_p13 }
  0x1e   : > { %p1576_p2 = pnand %p1575_p3, %p1569_p0 }
  0x20   : > { %1579 = shalt.err (!%p1576_p2)
}
  0x21   : > { %s1593_s17 = smov 64   ;;  %s1594_s18 = smov 4  }
  0x22   : > { %1414 = dma.hbm_to_vmem [thread:$0]  (!%p1663_p5), %s1824_s1, 6272, %s216_s29, [#allocation4], %s1593_s17, %s1593_s17, %s1594_s18  }
  0x23   : > { %p1837_p6 = scmp.ne.s32.totalorder %s1834_s6, 0 }
  0x24   : > { %p1838_p8 = scmp.ne.s32.totalorder (!%p1837_p6), %s1835_s30, 0 }
  0x25   : > { %256 = sbr.rel (%p1837_p6) target bundleno = 769 (0x301), region = 48 }
  0x2c   : > { %1585 = dma.done.wait (%p1838_p8), [#allocation4], 6272  }
  0x2d   : > { %1587 = vsyncadd (%p1838_p8), [#allocation4], 4294961024  ;;  %v1431_v1 = vld [vmem:[#allocation3 + $0x40] sm:$0xff]   ;;  %v1435_v5 = vld [vmem:[#allocation3 + $0x48] sm:$0xff]   ;;  %s1224_s21 = sshll.u32 %s1217_s27, 1  ;;  %v1595_v48 = vmov 0.0  }
  0x2e   : > { %v1432_v2 = vld [vmem:[#allocation3] sm:$0xff]   ;;  %1305 = vmatprep.subr.bf16.mxu0 %v1431_v1  ;;  %v1436_v6 = vld [vmem:[#allocation3 + $0x8] sm:$0xff]   ;;  %v1439_v9 = vld [vmem:[#allocation3 + $0x50] sm:$0xff]   ;;  %p290_p2 = scmp.lt.s32.totalorder %s1224_s21, 3  ;;  %vm1596_vm0 = vmmov 0   ;;  %vm829_vm1 = vcmask 130048  }
  0x2f   : > { %v1433_v3 = vld [vmem:[#allocation3 + $0xc0] sm:$0xff]   ;;  %1306 = vmatpush3.bf16.msra.mxu0 %v1432_v2  ;;  %v1437_v7 = vld [vmem:[#allocation3 + $0xc8] sm:$0xff]   ;;  %v1440_v10 = vld [vmem:[#allocation3 + $0x10] sm:$0xff]   ;;  %vm1029_vm2 = vcmask 1043456   ;;  %vm1597_vm3 = vmmov 1   ;;  %vm1022_vm5 = vcmask 228352  }
  0x30   : > { %v1434_v4 = vld [vmem:[#allocation3 + $0x80] sm:$0xff]   ;;  %1327 = vmatprep.subr.bf16.mxu1 %v1433_v3  ;;  %1307 = vmatprep.subr.bf16.mxu0 %v1435_v5  ;;  %v1438_v8 = vld [vmem:[#allocation3 + $0x88] sm:$0xff]   ;;  %v1441_v11 = vld [vmem:[#allocation3 + $0xd0] sm:$0xff]   ;;  %s1840_s21 = smov (!%p290_p2, %s1224_s21), 3  ;;  %vm1146_vm6 = vcmask 7168  }
  0x31   : > { %1328 = vmatpush3.bf16.msra.mxu1 %v1434_v4  ;;  %v1442_v12 = vld [vmem:[#allocation3 + $0x90] sm:$0xff]   ;;  %v1443_v13 = vld [vmem:[#allocation3 + $0x58] sm:$0xff]   ;;  %v1447_v17 = vld [vmem:[#allocation3 + $0x60] sm:$0xff]   ;;  %s1406_s22 = smul.u32 28, %s1840_s21  ;;  %s1227_s17 = sshll.u32 %s1840_s21, 3 }
  0x32   : > { %1329 = vmatprep.subr.bf16.mxu1 %v1437_v7  ;;  %v1444_v14 = vld [vmem:[#allocation3 + $0x18] sm:$0xff]   ;;  %v1448_v18 = vld [vmem:[#allocation3 + $0x20] sm:$0xff]   ;;  %v1451_v21 = vld [vmem:[#allocation3 + $0x68] sm:$0xff]   ;;  %s300_s20 = scalar_lea.vmem %s1830_s7, %s1227_s17 }
  0x33   : > { %1308 = vmatpush3.bf16.msra.mxu0 %v1436_v6  ;;  %v1445_v15 = vld [vmem:[#allocation3 + $0xd8] sm:$0xff]   ;;  %v1449_v19 = vld [vmem:[#allocation3 + $0xe0] sm:$0xff]   ;;  %v1452_v22 = vld [vmem:[#allocation3 + $0x28] sm:$0xff]   ;;  %s1697_s25 = scalar_lea.vmem %s1823_s0, %s1406_s22 }
  0x34   : > { %1309 = vmatprep.subr.bf16.mxu0 %v1439_v9  ;;  %v1446_v16 = vld [vmem:[#allocation3 + $0x98] sm:$0xff]   ;;  %v1450_v20 = vld [vmem:[#allocation3 + $0xa0] sm:$0xff]   ;;  %v1453_v23 = vld [vmem:[#allocation3 + $0xe8] sm:$0xff]  }
  0x35   : > { %1330 = vmatpush3.bf16.msra.mxu1 %v1438_v8  ;;  %v1454_v24 = vld [vmem:[#allocation3 + $0xa8] sm:$0xff]   ;;  %v1455_v25 = vld [vmem:[#allocation3 + $0x70] sm:$0xff]   ;;  %v1459_v29 = vld [vmem:[#allocation3 + $0x78] sm:$0xff]  }
  0x36   : > { %1331 = vmatprep.subr.bf16.mxu1 %v1441_v11  ;;  %v1456_v26 = vld [vmem:[#allocation3 + $0x30] sm:$0xff]   ;;  %v1460_v30 = vld [vmem:[#allocation3 + $0x38] sm:$0xff]   ;;  %v1463_v39 = vld [vmem:[#allocation3 + $0x140] sm:$0xff]  }
  0x37   : > { %1310 = vmatpush3.bf16.msra.mxu0 %v1440_v10  ;;  %v1457_v27 = vld [vmem:[#allocation3 + $0xf0] sm:$0xff]   ;;  %v1461_v31 = vld [vmem:[#allocation3 + $0xf8] sm:$0xff]   ;;  %v1710_v40 = vld [vmem:[%s1697_s25 + $0x8] sm:$0xff] }
  0x38   : > { %1311 = vmatprep.subr.bf16.mxu0 %v1443_v13  ;;  %v1458_v28 = vld [vmem:[#allocation3 + $0xb0] sm:$0xff]   ;;  %v1700_v32 = vld [vmem:[%s1697_s25] sm:$0xff]  ;;  %v313_v44 = vunpack.c.l.bf16 %v1710_v40  ;;  %v314_v47 = vunpack.c.h.bf16 %v1710_v40  ;;  %vm1401_vm4 = vmpackc.low %vm1029_vm2, %vm1597_vm3 }
  0x39   : > { %1332 = vmatpush3.bf16.msra.mxu1 %v1442_v12  ;;  %v1703_v33 = vld [vmem:[%s1697_s25 + $0x1c] sm:$0xff]  ;;  %v311_v34 = vunpack.c.l.bf16 %v1700_v32  ;;  %v312_v35 = vunpack.c.h.bf16 %v1700_v32  ;;  %v1722_v46 = vld [vmem:[%s1697_s25 + $0x24] sm:$0xff]  ;;  %v1737_v4 = vld [vmem:[%s1697_s25 + $0x10] sm:$0xff] }
  0x3a   : > { %1333 = vmatprep.subr.bf16.mxu1 %v1445_v15  ;;  %v318_v36 = vunpack.c.l.bf16 %v1703_v33  ;;  %v319_v37 = vunpack.c.h.bf16 %v1703_v33  ;;  %v1462_v38 = vld [vmem:[#allocation3 + $0xb8] sm:$0xff]   ;;  %v320_v49 = vunpack.c.l.bf16 %v1722_v46  ;;  %v321_v50 = vunpack.c.h.bf16 %v1722_v46  ;;  %v1740_v5 = vld [vmem:[%s1697_s25 + $0x2c] sm:$0xff]  ;;  %v1479_v40 = vld [vmem:[#allocation3 + $0x180] sm:$0xff]  }
  0x3b   : > { %1312 = vmatpush3.bf16.msra.mxu0 %v1444_v14  ;;  %v1228_v41 = vmul.f32 -1.442695, %v311_v34  ;;  %v1229_v42 = vmul.f32 -1.442695, %v312_v35  ;;  %v1230_v51 = vmul.f32 -1.442695, %v313_v44  ;;  %v315_v8 = vunpack.c.l.bf16 %v1737_v4 }
  0x3c   : > { %1313 = vmatprep.subr.bf16.mxu0 %v1447_v17  ;;  %v1235_v43 = vmul.f32 -1.442695, %v318_v36  ;;  %v1236_v45 = vmul.f32 -1.442695, %v319_v37  ;;  %v1231_v52 = vmul.f32 -1.442695, %v314_v47  ;;  %v316_v9 = vunpack.c.h.bf16 %v1737_v4 }
  0x3d   : > { %1334 = vmatpush3.bf16.msra.mxu1 %v1446_v16  ;;  %1480 = vpow2.f32 %v1228_v41  ;;  %v1237_v53 = vmul.f32 -1.442695, %v320_v49  ;;  %v1238_v54 = vmul.f32 -1.442695, %v321_v50  ;;  %v1745_v10 = vld [vmem:[%s1697_s25 + $0x18] ss:$28 sps:$4 sm:$0xff]   ;;  %v322_v12 = vunpack.c.l.bf16 %v1740_v5 }
  0x3e   : > { %1335 = vmatprep.subr.bf16.mxu1 %v1449_v19  ;;  %1482 = vpow2.f32 %v1229_v42  ;;  %v323_v13 = vunpack.c.h.bf16 %v1740_v5  ;;  %v1232_v14 = vmul.f32 -1.442695, %v315_v8  ;;  %v1233_v15 = vmul.f32 -1.442695, %v316_v9  ;;  %v1013_v4 = vld [vmem:[%s1826_s3 + $0x10] sm:$0xff] }
  0x3f   : > { %1314 = vmatpush3.bf16.msra.mxu0 %v1448_v18  ;;  %1484 = vpow2.f32 %v1235_v43  ;;  %v317_v16 = vunpack.c.l.bf16 %v1745_v10  ;;  %v1239_v17 = vmul.f32 -1.442695, %v322_v12  ;;  %v324_v19 = vunpack.c.h.bf16 %v1745_v10  ;;  %v1465_v43 = vld [vmem:[#allocation3 + $0x148] sm:$0xff]   ;;  %v1478_v10 = vld [vmem:[#allocation3 + $0x138] sm:$0xff]  }
  0x40   : > { %1315 = vmatprep.subr.bf16.mxu0 %v1451_v21  ;;  %1486 = vpow2.f32 %v1236_v45  ;;  %v1240_v18 = vmul.f32 -1.442695, %v323_v13  ;;  %v1014_v5 = vld [vmem:[%s1826_s3 + $0x18] sm:$0xf] }
  0x41   : > { %1336 = vmatpush3.bf16.msra.mxu1 %v1450_v20  ;;  %1488 = vpow2.f32 %v1230_v51  ;;  %v1234_v20 = vmul.f32 -1.442695, %v317_v16  ;;  %v1241_v21 = vmul.f32 -1.442695, %v324_v19 }
  0x42   : > { %1337 = vmatprep.subr.bf16.mxu1 %v1453_v23  ;;  %1490 = vpow2.f32 %v1231_v52 }
  0x43   : > { %1316 = vmatpush3.bf16.msra.mxu0 %v1452_v22  ;;  %1492 = vpow2.f32 %v1237_v53  ;;  %v1466_v53 = vld [vmem:[#allocation3 + $0x108] sm:$0xff]  }
  0x44   : > { %1317 = vmatprep.subr.bf16.mxu0 %v1455_v25  ;;  %1494 = vpow2.f32 %v1238_v54 }
  0x45   : > { %1338 = vmatpush3.bf16.msra.mxu1 %v1454_v24 }
  0x46   : > { %1339 = vmatprep.subr.bf16.mxu1 %v1457_v27 }
  0x47   : > { %1318 = vmatpush3.bf16.msra.mxu0 %v1456_v26  ;;  %v1481_v55 = vpop.eup %1480 }
  0x48   : > { %1319 = vmatprep.subr.bf16.mxu0 %v1459_v29  ;;  %v1483_v56 = vpop.eup %1482  ;;  %v367_v57 = vadd.f32 1.0, %v1481_v55  ;;  %v1467_v55 = vld [vmem:[#allocation3 + $0x150] sm:$0xff]  }
  0x49   : > { %1340 = vmatpush3.bf16.msra.mxu1 %v1458_v28  ;;  %v1485_v58 = vpop.eup %1484  ;;  %v368_v59 = vadd.f32 1.0, %v1483_v56 }
  0x4a   : > { %1341 = vmatprep.subr.bf16.mxu1 %v1461_v31  ;;  %v1487_v60 = vpop.eup %1486  ;;  %v374_v61 = vadd.f32 1.0, %v1485_v58  ;;  %1496 = vrcp.f32 %v367_v57 }
  0x4b   : > { %1320 = vmatpush3.bf16.msra.mxu0 %v1460_v30  ;;  %v1489_v62 = vpop.eup %1488  ;;  %v375_v63 = vadd.f32 1.0, %v1487_v60  ;;  %1498 = vrcp.f32 %v368_v59  ;;  %v1469_v59 = vld [vmem:[#allocation3 + $0x158] sm:$0xff]  }
  0x4c   : > { %1349 = vmatprep.subr.bf16.mxu0 %v1463_v39  ;;  %v1491_v0 = vpop.eup %1490  ;;  %1500 = vrcp.f32 %v374_v61  ;;  %v369_v1 = vadd.f32 1.0, %v1489_v62  ;;  %v1470_v62 = vld [vmem:[#allocation3 + $0x118] sm:$0xff]  }
  0x4d   : > { %1342 = vmatpush3.bf16.msra.mxu1 %v1462_v38  ;;  %v1493_v2 = vpop.eup %1492  ;;  %1502 = vrcp.f32 %v375_v63  ;;  %v370_v3 = vadd.f32 1.0, %v1491_v0  ;;  %v1471_v63 = vld [vmem:[#allocation3 + $0x160] sm:$0xff]  }
  0x4e   : > { %1379 = vmatprep.subr.bf16.mxu1 %v1595_v48  ;;  %v1495_v6 = vpop.eup %1494  ;;  %v376_v7 = vadd.f32 1.0, %v1493_v2  ;;  %1504 = vrcp.f32 %v369_v1  ;;  %v1472_v1 = vld [vmem:[#allocation3 + $0x120] sm:$0xff]   ;;  %v1473_v2 = vld [vmem:[#allocation3 + $0x168] sm:$0xff]  }
  0x4f   : > { %v377_v11 = vadd.f32 1.0, %v1495_v6  ;;  %1506 = vrcp.f32 %v370_v3 }
  0x50   : > { %1508 = vrcp.f32 %v376_v7 }
  0x51   : > { %1510 = vrcp.f32 %v377_v11 }
  0x52   : > { %1512 = vpow2.f32 %v1232_v14  ;;  %v1474_v14 = vld [vmem:[#allocation3 + $0x128] sm:$0xff]  }
  0x53   : > { %1514 = vpow2.f32 %v1233_v15 }
  0x54   : > { %v1497_v22 = vpop.eup %1496  ;;  %1516 = vpow2.f32 %v1239_v17  ;;  %v1475_v17 = vld [vmem:[#allocation3 + $0x170] sm:$0xff]  }
  0x55   : > { %v1499_v23 = vpop.eup %1498  ;;  %v409_v24 = vmul.f32 %v1497_v22, %v311_v34  ;;  %1518 = vpow2.f32 %v1240_v18 }
  0x56   : > { %v1501_v25 = vpop.eup %1500  ;;  %v410_v26 = vmul.f32 %v1499_v23, %v312_v35  ;;  %1520 = vpow2.f32 %v1234_v20  ;;  %v1464_v35 = vld [vmem:[#allocation3 + $0x100] sm:$0xff]   ;;  %v1476_v23 = vld [vmem:[#allocation3 + $0x130] sm:$0xff]  }
  0x57   : > { %v1503_v27 = vpop.eup %1502  ;;  %v416_v28 = vmul.f32 %v1501_v25, %v318_v36  ;;  %1522 = vpow2.f32 %v1241_v21  ;;  %v1011_v25 = vld [vmem:[%s1826_s3] sm:$0xff] }
  0x58   : > { %v1505_v29 = vpop.eup %1504  ;;  %v417_v30 = vmul.f32 %v1503_v27, %v319_v37 }
  0x59   : > { %v1507_v31 = vpop.eup %1506  ;;  %v423_v38 = vpack.c.bf16 %v416_v28, %v409_v24  ;;  %v411_v34 = vmul.f32 %v1505_v29, %v313_v44  ;;  %v1242_v28 = vld [vmem:[%s1825_s2] ss:$0 sm:$0xff] }
  0x5a   : > { %v1509_v39 = vpop.eup %1508  ;;  %v424_v41 = vpack.c.bf16 %v417_v30, %v410_v26  ;;  %v412_v32 = vmul.f32 %v1507_v31, %v314_v47  ;;  %v1012_v26 = vld [vmem:[%s1826_s3 + $0x8] sm:$0xff] }
  0x5b   : > { %v1511_v42 = vpop.eup %1510  ;;  %v418_v36 = vmul.f32 %v1509_v39, %v320_v49  ;;  %v1396_v27 = vpack.c.bf16 %v1012_v26, %v1011_v25 }
  0x5c   : > { %v1513_v45 = vpop.eup %1512  ;;  %865 = vmatprep.mubr.bf16.mxu0 %v424_v41  ;;  %v419_v33 = vmul.f32 %v1511_v42, %v321_v50  ;;  %v1468_v50 = vld [vmem:[#allocation3 + $0x110] sm:$0xff]  }
  0x5d   : > { %v1515_v37 = vpop.eup %1514  ;;  %866 = vmatmul.mubr.bf16.vlgmr.msra.gmra.mrb[0].mxu0 %v423_v38  ;;  %v425_v51 = vpack.c.bf16 %v418_v36, %v411_v34  ;;  %v371_v60 = vadd.f32 1.0, %v1513_v45 }
  0x5e   : > { %v1517_v44 = vpop.eup %1516  ;;  %v426_v52 = vpack.c.bf16 %v419_v33, %v412_v32  ;;  %1350 = vmatpush3.bf16.msra.mxu0 %v1464_v35  ;;  %v372_v47 = vadd.f32 1.0, %v1515_v37 }
  0x5f   : > { %v1519_v54 = vpop.eup %1518  ;;  %1351 = vmatprep.subr.bf16.mxu0 %v1465_v43  ;;  %v378_v61 = vadd.f32 1.0, %v1517_v44 }
  0x60   : > { %v1521_v56 = vpop.eup %1520  ;;  %906 = vmatprep.mubr.bf16.mxu1 %v426_v52  ;;  %v379_v49 = vadd.f32 1.0, %v1519_v54  ;;  %1524 = vrcp.f32 %v372_v47 }
  0x61   : > { %v1523_v57 = vpop.eup %1522  ;;  %907 = vmatmul.mubr.bf16.vlgmr.msra.gmra.mrb[0].mxu1 %v425_v51  ;;  %v373_v46 = vadd.f32 1.0, %v1521_v56 }
  0x62   : > { %1352 = vmatpush3.bf16.msra.mxu0 %v1466_v53  ;;  %1380 = vmatpush3.bf16.msra.mxu1 %v1479_v40  ;;  %1526 = vrcp.f32 %v379_v49  ;;  %v380_v58 = vadd.f32 1.0, %v1523_v57 }
  0x63   : > { %1353 = vmatprep.subr.bf16.mxu0 %v1467_v55  ;;  %1381 = vmatprep.mubr.msk.bf16.mxu1 %vm1596_vm0, %v1595_v48  ;;  %1528 = vrcp.f32 %v373_v46 }
  0x64   : > { %1530 = vrcp.f32 %v380_v58  ;;  %1397 = vmatprep.subr.bf16.mxu1 %v1396_v27 }
  0x65   : > { %1532 = vrcp.f32 %v371_v60 }
  0x66   : > { %1354 = vmatpush3.bf16.msra.mxu0 %v1468_v50  ;;  %1534 = vrcp.f32 %v378_v61 }
  0x67   : > { %1355 = vmatprep.subr.bf16.mxu0 %v1469_v59 }
  0x6a   : > { %v1525_v0 = vpop.eup %1524  ;;  %1356 = vmatpush3.bf16.msra.mxu0 %v1470_v62 }
  0x6b   : > { %1357 = vmatprep.subr.bf16.mxu0 %v1471_v63  ;;  %v414_v3 = vmul.f32 %v1525_v0, %v316_v9 }
  0x6c   : > { %v1527_v6 = vpop.eup %1526 }
  0x6d   : > { %v1529_v7 = vpop.eup %1528  ;;  %v421_v48 = vmul.f32 %v1527_v6, %v323_v13  ;;  %v1477_v13 = vld [vmem:[#allocation3 + $0x178] sm:$0xff]  }
  0x6e   : > { %v1531_v11 = vpop.eup %1530  ;;  %1358 = vmatpush3.bf16.msra.mxu0 %v1472_v1  ;;  %v415_v15 = vmul.f32 %v1529_v7, %v317_v16  ;;  %v1295_v7 = vld [vmem:[%s1827_s4] ss:$0 sm:$0xff] }
  0x6f   : > { %1359 = vmatprep.subr.bf16.mxu0 %v1473_v2  ;;  %v428_v18 = vpack.c.bf16 %v421_v48, %v414_v3  ;;  %v422_v20 = vmul.f32 %v1531_v11, %v324_v19  ;;  %v1533_v21 = vpop.eup %1532 }
  0x70   : > { %v1535_v22 = vpop.eup %1534  ;;  %v413_v16 = vmul.f32 %v1533_v21, %v315_v8  ;;  %v1400_v8 = vpack.c.bf16 %v1014_v5, %v1013_v4  ;;  %v1302_v4 = vld [vmem:[#allocation2] ss:$0 sm:$0xff] }
  0x71   : > { %947 = vmatprep.mubr.bf16.mxu0 %v428_v18  ;;  %v429_v9 = vpack.c.bf16 %v422_v20, %v415_v15  ;;  %v420_v24 = vmul.f32 %v1535_v22, %v322_v12 }
  0x72   : > { %1360 = vmatpush3.bf16.msra.mxu0 %v1474_v14 }
  0x73   : > { %1361 = vmatprep.subr.bf16.mxu0 %v1475_v17  ;;  %1382 = vmatmul.mubr.msk.bf16.vlgmr.msra.gmra.mrb[4].mxu1 %vm829_vm1, %v429_v9  ;;  %v427_v19 = vpack.c.bf16 %v420_v24, %v413_v16  ;;  %v1301_v16 = vld [vmem:[%s1828_s5] ss:$0 sm:$0xff] }
  0x74   : > { %1399 = vmatpush3.bf16.msra.mxu1 %v1396_v27 }
  0x75   : > { %1402 = vmatprep.subr.msk.bf16.mxu1 %vm1401_vm4, %v1400_v8 }
  0x76   : > { %1362 = vmatpush3.bf16.msra.mxu0 %v1476_v23 }
  0x77   : > { %1363 = vmatprep.subr.bf16.mxu0 %v1477_v13 }
  0x78   : > { %1405 = vmatpush3.bf16.msk.msra.mxu1 %vm1401_vm4, %v1400_v8 }
  0x7a   : > { %1364 = vmatpush3.bf16.msra.mxu0 %v1478_v10 }
  0x7d   : > { %948 = vmatmul.mubr.bf16.vlgmr.msra.gmra.mrb[4].mxu0 %v427_v19 }
 0x130   : > { %v1321_v12 = vpop.f32.mrb[0].mxu0 }
 0x131   : > { %v1322_v29 = vpop.f32.mrb[1].mxu0 }
 0x132   : > { %v1323_v30 = vadd.f32 %v1322_v29, %v1321_v12  ;;  %v1324_v31 = vpop.f32.mrb[2].mxu0 }
 0x133   : > { %v1325_v38 = vpop.f32.mrb[3].mxu0 }
 0x134   : > { %v868_v34 = vadd.f32 %v1323_v30, %v1242_v28  ;;  %v1343_v39 = vpop.f32.mrb[0].mxu1  ;;  %v1326_v41 = vadd.f32 %v1325_v38, %v1324_v31 }
 0x135   : > { %v1344_v32 = vpop.f32.mrb[1].mxu1 }
 0x136   : > { %v871_v35 = vadd.f32 %v1326_v41, %v1242_v28  ;;  %v1345_v42 = vadd.f32 %v1344_v32, %v1343_v39  ;;  %v1346_v36 = vpop.f32.mrb[2].mxu1 }
 0x137   : > { %v1347_v43 = vpop.f32.mrb[3].mxu1 }
 0x138   : > { %v909_v45 = vadd.f32 %v1345_v42, %v868_v34  ;;  %v1348_v33 = vadd.f32 %v1347_v43, %v1346_v36 }
 0x13a   : > { %v912_v37 = vadd.f32 %v1348_v33, %v871_v35 }
 0x146   : > { %v990_v51 = vpop.f32.mrb[4].mxu1 }
 0x147   : > { %v1383_v44 = vpop.f32.mrb[5].mxu1 }
 0x148   : > { %v993_v52 = vpop.f32.mrb[6].mxu1 }
 0x149   : > { %v1384_v53 = vpop.f32.mrb[7].mxu1 }
 0x150   : > { %v1365_v40 = vpop.f32.mrb[4].mxu0 }
 0x151   : > { %v1366_v47 = vpop.f32.mrb[5].mxu0 }
 0x152   : > { %v1367_v54 = vadd.f32 %v1366_v47, %v1365_v40  ;;  %v1368_v55 = vpop.f32.mrb[6].mxu0 }
 0x153   : > { %v1369_v56 = vpop.f32.mrb[7].mxu0 }
 0x154   : > { %v950_v49 = vadd.f32 %v1367_v54, %v909_v45  ;;  %v1370_v57 = vadd.f32 %v1369_v56, %v1368_v55 }
 0x156   : > { %v991_v46 = vadd.f32 %v990_v51, %v950_v49  ;;  %v953_v50 = vadd.f32 %v1370_v57, %v912_v37 }
 0x158   : > { %v1293_v58 = vmul.f32 -1.442695, %v991_v46  ;;  %v994_v59 = vadd.f32 %v993_v52, %v953_v50 }
 0x15a   : > { %1536 = vpow2.f32 %v1293_v58  ;;  %v1294_v60 = vmul.f32 -1.442695, %v994_v59 }
 0x15c   : > { %1538 = vpow2.f32 %v1294_v60 }
 0x164   : > { %v1537_v61 = vpop.eup %1536 }
 0x165   : > { %v1003_v62 = vadd.f32 1.0, %v1537_v61 }
 0x166   : > { %v1539_v63 = vpop.eup %1538 }
 0x167   : > { %1540 = vrcp.f32 %v1003_v62  ;;  %v1004_v0 = vadd.f32 1.0, %v1539_v63 }
 0x169   : > { %1542 = vrcp.f32 %v1004_v0 }
 0x171   : > { %v1541_v1 = vpop.eup %1540 }
 0x172   : > { %v1009_v2 = vmul.f32 %v1541_v1, %v991_v46 }
 0x173   : > { %v1543_v3 = vpop.eup %1542 }
 0x174   : > { %v1010_v6 = vmul.f32 %v1543_v3, %v994_v59  ;;  %1393 = vmatprep.mubr.msk.f32.mxu1 %vm1022_vm5, %v1009_v2 }
 0x176   : > { %1394 = vmatmul.mubr.msk.f32.vlgmr.msra.gmra.mrb[8].mxu1 %vm1022_vm5, %v1010_v6 }
 0x249   : > { %v1395_v48 = vpop.f32.mrb[8].mxu1 }
 0x24a   : > { %v1105_v11 = vadd.f32 %v1395_v48, %v1295_v7  ;;  %v1099_v14 = vpop.f32.mrb[9].mxu1 }
 0x24b   : > { %v1100_v15 = vadd.f32 %v1295_v7, %v1099_v14 }
 0x24c   : > { %v1300_v17 = vmul.f32 -1.442695, %v1105_v11 }
 0x24d   : > { %v1299_v18 = vmul.f32 -1.442695, %v1100_v15 }
 0x24e   : > { %1544 = vpow2.f32 %v1300_v17 }
 0x24f   : > { %1546 = vpow2.f32 %v1299_v18 }
 0x258   : > { %v1545_v20 = vpop.eup %1544 }
 0x259   : > { %v1547_v21 = vpop.eup %1546  ;;  %v1115_v9 = vadd.f32 1.0, %v1545_v20 }
 0x25a   : > { %v1114_v22 = vadd.f32 1.0, %v1547_v21 }
 0x25b   : > { %1548 = vrcp.f32 %v1115_v9 }
 0x25c   : > { %1550 = vrcp.f32 %v1114_v22 }
 0x265   : > { %v1549_v23 = vpop.eup %1548 }
 0x266   : > { %v1551_v13 = vpop.eup %1550  ;;  %v1121_v24 = vmul.f32 %v1549_v23, %v1105_v11 }
 0x267   : > { %v1120_v10 = vmul.f32 %v1551_v13, %v1100_v15 }
 0x268   : > { %v1130_v26 = vmul.f32 %v1301_v16, %v1121_v24 }
 0x269   : > { %v1129_v19 = vmul.f32 %v1301_v16, %v1120_v10 }
 0x26a   : > { %v1134_v27 = vsel %vm829_vm1, %v1130_v26, 0.0 }
 0x26b   : > { %v1131_v25 = vsel %vm829_vm1, %v1129_v19, 0.0 }
 0x26c   : > { %1132 = vadd.xlane.f32.xlu0 %v1131_v25 }
 0x270   : > { %1135 = vadd.xlane.f32.xlu0 %v1134_v27 }
 0x2f9   : > { %v1133_v5 = vpop.xlane.xlu0 %1132 }
 0x2fa   : > { %v1144_v8 = vadd.f32 %v1302_v4, %v1133_v5 }
 0x2fc   : > { %1147 = vst.msk [vmem:[%s300_s20] sm:$0xff] %vm1146_vm6, %v1144_v8 }
 0x2fd   : > { %v1136_v12 = vpop.xlane.xlu0 %1135 }
 0x2fe   : > { %v1145_v28 = vadd.f32 %v1302_v4, %v1136_v12 }
 0x300   : > { %1148 = vst.msk [vmem:[%s300_s20 + $0x8] sm:$0xff] %vm1146_vm6, %v1145_v28 }
 0x301 PF: > { %s20_s26 = sadd.s32 1, %s1590_s26  }
 0x302   : > { %p17_p3 = scmp.ge.s32.totalorder %s20_s26, 4  }
 0x304   :  { %19 = sbr.rel (!%p17_p3) target bundleno = 4 (0x4), region = 83 }
 0x30b   :  { %1171 = vsyncpa [#allocation4], 1 }
 0x30c   :  { %1173 = vsyncpa [#allocation4 + $0x1], 1 }

</bundles_post_ra>
